<compile_context>
chip_gen: v7x
topology: tpu7x:2x2x1
jax: 0.10.0
libtpu: 0.0.40
codegen_flags: <defaults>
</compile_context>

<pallas_src>
import functools

import jax
import jax.numpy as jnp
from jax.experimental import pallas as pl
from jax.experimental.pallas import tpu as pltpu


_LANE = 128
_MIB = 1024 * 1024


def _mse3d_kernel(out_ref, tgt_hbm, partial_ref, tgt_buf, sem, *, off, ft, flat):
    # out_ref    : (b, ft)       VMEM tile of flattened `output` (auto-pipelined).
    # tgt_hbm    : (b, t_tgt*n)  raw HBM ref of flattened `target` (pl.ANY).
    # partial_ref: (1, ft)       lane-resident per-block partial sums (f32).
    # tgt_buf    : (b, ft)       VMEM scratch the lag-aligned target window lands in.
    # sem        : DMA semaphore.
    j = pl.program_id(0)
    col0 = off + j * ft          # column in flattened target; lag folded into the DMA
    rem = flat % ft              # static Python int

    def _fetch(width):           # width is static in each branch
        cp = pltpu.make_async_copy(
            tgt_hbm.at[:, pl.ds(col0, width)],
            tgt_buf.at[:, pl.ds(0, width)],
            sem,
        )
        cp.start()
        cp.wait()

    if rem == 0:
        _fetch(ft)
    else:
        last = pl.num_programs(0) - 1

        @pl.when(j != last)
        def _():
            _fetch(ft)

        @pl.when(j == last)
        def _():
            _fetch(rem)          # only the valid remainder columns are DMA'd

    diff = out_ref[...].astype(jnp.float32) - tgt_buf[...].astype(jnp.float32)
    sq = diff * diff

    # Reduce only over the batch (sublane) axis: result stays lane-resident.
    col = jnp.sum(sq, axis=0, keepdims=True)            # (1, ft)

    if rem != 0:
        # Zero padded lanes of the edge block (stale VMEM garbage beyond `flat`).
        # Masking the (1, ft) column sums is b× cheaper than masking sq itself,
        # and no masking code is emitted at all when shapes divide evenly.
        lane = jax.lax.broadcasted_iota(jnp.int32, col.shape, 1)
        col = jnp.where(j * ft + lane < flat, col, 0.0)

    partial_ref[...] = col


def _pick_vmem_limit():
    """Generation-aware scoped-VMEM limit (bytes)."""
    try:
        phys = pltpu.get_tpu_info().vmem_capacity_bytes
    except Exception:
        phys = 64 * _MIB                      # conservative fallback (v7x per-TC)
    return int(max(32 * _MIB, min((phys * 3) // 4, 96 * _MIB)))


@jax.jit
def mse3d(output, target):
    """Pallas equivalent of MSE3d().forward(output, target) -> scalar f32."""
    b, t_out, n = output.shape
    b_t, t_tgt, n_t = target.shape
    assert b_t == b and n_t == n, "batch / neuron dims must match"
    lag = t_tgt - t_out

    flat = t_out * n          # flattened (time, neuron) width of `output`
    off = lag * n             # flattened column offset of the aligned target window

    # Free reshapes (trailing contiguous dims) — lane-dense layout for small n.
    out2 = output.reshape(b, flat)
    tgt2 = target.reshape(b, t_tgt * n)

    out_isz = jnp.dtype(output.dtype).itemsize
    tgt_isz = jnp.dtype(target.dtype).itemsize
    isz = max(out_isz, tgt_isz)

    # VMEM budgeting: ~3 block-sized buffers live per step (double-buffered
    # output block + single target scratch); keep them under half the limit.
    vmem_limit = _pick_vmem_limit()
    budget = vmem_limit // 6                  # per-buffer budget in bytes

    ft_cap = max(_LANE, ((budget // max(1, b * isz)) // _LANE) * _LANE)
    ft = flat if flat <= ft_cap else ft_cap   # 128-multiple, or full width
    g_f = pl.cdiv(flat, ft)

    kernel = functools.partial(_mse3d_kernel, off=off, ft=ft, flat=flat)

    grid_spec = pltpu.PrefetchScalarGridSpec(
        num_scalar_prefetch=0,
        grid=(g_f,),
        in_specs=[
            # Flattened output: auto-pipelined, lane-dense blocks.
            pl.BlockSpec((b, ft), lambda j: (0, j)),
            # Flattened target stays in HBM; the lag-offset window is DMA'd
            # manually inside the kernel (no lag-prefix traffic).
            pl.BlockSpec(memory_space=pl.ANY),
        ],
        out_specs=pl.BlockSpec((1, ft), lambda j: (0, j)),
        scratch_shapes=[
            pltpu.VMEM((b, ft), target.dtype),
            pltpu.SemaphoreType.DMA(()),
        ],
    )

    partials = pl.pallas_call(
        kernel,
        out_shape=jax.ShapeDtypeStruct((1, flat), jnp.float32),
        grid_spec=grid_spec,
        compiler_params=pltpu.CompilerParams(
            dimension_semantics=("parallel",),
            vmem_limit_bytes=vmem_limit,
        ),
        cost_estimate=pl.CostEstimate(
            flops=3 * b * flat,
            transcendentals=0,
            # Target bytes now exclude the unused lag prefix.
            bytes_accessed=b * flat * out_isz + b * flat * tgt_isz + flat * 4,
        ),
    )(out2, tgt2)

    # Tiny epilogue: cross-lane sum of the per-lane partials.
    return jnp.sum(partials)


def _reference(output, target):
    lag = target.shape[1] - output.shape[1]
    diff = output.astype(jnp.float32) - target[:, lag:, :].astype(jnp.float32)
    return jnp.sum(jnp.sum(diff ** 2, axis=-1))


if __name__ == "__main__":
    key = jax.random.PRNGKey(0)
    k1, k2 = jax.random.split(key)

    B, T_OUT, T_TGT, N = 2, 8, 12, 32   # lag = 4
    output = jax.random.normal(k1, (B, T_OUT, N), dtype=jnp.float32)
    target = jax.random.normal(k2, (B, T_TGT, N), dtype=jnp.float32)

    result = jax.block_until_ready(mse3d(output, target))
    expected = jax.block_until_ready(_reference(output, target))

    assert jnp.allclose(result, expected, rtol=1e-5, atol=1e-5), (result, expected)
    print("KERNEL_OK")
</pallas_src>

<mosaic_0001>
module attributes {stable_mosaic.version = 11 : i64} {
  func.func @_mse3d_kernel(%arg0: i32, %arg1: memref<2x256xf32, #tpu.memory_space<vmem>>, %arg2: memref<2x384xf32, #tpu.memory_space<any>>, %arg3: memref<1x256xf32, #tpu.memory_space<vmem>>, %arg4: memref<2x256xf32, #tpu.memory_space<vmem>>, %arg5: memref<!tpu.dma_semaphore, #tpu.memory_space<semaphore_mem>>) attributes {dimension_semantics = [#tpu.dimension_semantics<parallel>], iteration_bounds = array<i64: 1>, scalar_prefetch = 0 : i64, scratch_operands = 2 : i64, tpu.core_type = #tpu.core_type<tc>, window_params = [{transform_indices = @transform_0, window_bounds = array<i64: 2, 256>}, {}, {transform_indices = @transform_2, window_bounds = array<i64: 1, 256>}]} {
    %c256_i32 = arith.constant 256 : i32
    %0 = arith.muli %arg0, %c256_i32 : i32
    %c128_i32 = arith.constant 128 : i32
    %1 = arith.addi %c128_i32, %0 : i32
    %c0_i32 = arith.constant 0 : i32
    %2 = tpu.memref_slice %arg2[%c0_i32, %1] : memref<2x384xf32, #tpu.memory_space<any>> -> memref<2x256xf32, #tpu.memory_space<any>>
    %c0_i32_0 = arith.constant 0 : i32
    %c0_i32_1 = arith.constant 0 : i32
    %3 = tpu.memref_slice %arg4[%c0_i32_0, %c0_i32_1] : memref<2x256xf32, #tpu.memory_space<vmem>> -> memref<2x256xf32, #tpu.memory_space<vmem>>
    tpu.enqueue_dma source(%2 : memref<2x256xf32, #tpu.memory_space<any>>) target(%3 : memref<2x256xf32, #tpu.memory_space<vmem>>) target_semaphore(%arg5 : memref<!tpu.dma_semaphore, #tpu.memory_space<semaphore_mem>>)
    %c0_i32_2 = arith.constant 0 : i32
    %4 = tpu.memref_slice %arg2[%c0_i32_2, %1] : memref<2x384xf32, #tpu.memory_space<any>> -> memref<2x256xf32, #tpu.memory_space<any>>
    %c0_i32_3 = arith.constant 0 : i32
    %c0_i32_4 = arith.constant 0 : i32
    %5 = tpu.memref_slice %arg4[%c0_i32_3, %c0_i32_4] : memref<2x256xf32, #tpu.memory_space<vmem>> -> memref<2x256xf32, #tpu.memory_space<vmem>>
    tpu.wait_dma2 semaphore(%arg5 : memref<!tpu.dma_semaphore, #tpu.memory_space<semaphore_mem>>) src(%4 : memref<2x256xf32, #tpu.memory_space<any>>) dst(%5 : memref<2x256xf32, #tpu.memory_space<vmem>>)
    %c0 = arith.constant 0 : index
    %c0_5 = arith.constant 0 : index
    %6 = vector.load %arg1[%c0, %c0_5] : memref<2x256xf32, #tpu.memory_space<vmem>>, vector<2x256xf32>
    %c0_6 = arith.constant 0 : index
    %c0_7 = arith.constant 0 : index
    %7 = vector.load %arg4[%c0_6, %c0_7] : memref<2x256xf32, #tpu.memory_space<vmem>>, vector<2x256xf32>
    %8 = arith.subf %6, %7 : vector<2x256xf32>
    %9 = arith.mulf %8, %8 : vector<2x256xf32>
    %cst = arith.constant dense<0.000000e+00> : vector<256xf32>
    %10 = vector.multi_reduction <add>, %9, %cst [0] : vector<2x256xf32> to vector<256xf32>
    %11 = vector.shape_cast %10 : vector<256xf32> to vector<1x256xf32>
    %c0_8 = arith.constant 0 : index
    %c0_9 = arith.constant 0 : index
    %12 = vector.load %arg3[%c0_8, %c0_9] : memref<1x256xf32, #tpu.memory_space<vmem>>, vector<1x256xf32>
    tpu.vector_store %arg3[%c0_8, %c0_9], %11 {strides = array<i32>} : memref<1x256xf32, #tpu.memory_space<vmem>>, vector<1x256xf32>,
    return
  }
  func.func @transform_0(%arg0: i32) -> (i32, i32) {
    %c0_i32 = arith.constant 0 : i32
    %c0_i32_0 = arith.constant 0 : i32
    return %c0_i32, %arg0 : i32, i32
  }
  func.func @transform_2(%arg0: i32) -> (i32, i32) {
    %c0_i32 = arith.constant 0 : i32
    %c0_i32_0 = arith.constant 0 : i32
    return %c0_i32, %arg0 : i32, i32
  }
}

</mosaic_0001>

<bundles_post_ra>
// kernel: mse3d.1
= control target key start
LH: loop header
LB: loop body
LE: loop exit
PB: predicated region body
PF: predicated region fallthrough
CT: control target
= control target key end

     0   :  { %s171_s0 = inlined_call_operand.vmem [shape: f32[2,256], index: 0, kind: input, shape index: {}]   ;;  %s172_s1 = inlined_call_operand.vmem [shape: f32[2,384], index: 1, kind: input, shape index: {}]   ;;  %s173_s2 = inlined_call_operand.vmem [shape: f32[1,256], index: 2, kind: output, shape index: {}]  }
   0x1   :  { %v139_v0 = vld [vmem:[%s172_s1 + $0x2] sm:$0xf] }
   0x2   :  { %33 = vst [vmem:[#allocation2] sm:$0xf] %v139_v0 }
   0x3   :  { %58 = vsyncadd [#allocation3], 64 }
   0x4   :  { %143 = dma.done.wait [#allocation3], 64 }
   0x5   :  { %144 = vsyncadd [#allocation3], 4294967232  ;;  %v71_v1 = vlaneseq  ;;  %v145_v2 = vmov 1983009808   ;;  %v63_v6 = vld [vmem:[%s171_s0] sm:$0xf] }
   0x6   :  { %v69_v3 = vunpack.c.l.s4 %v145_v2  ;;  %vm78_vm0 = vcmask 1041408   ;;  %v146_v20 = vmov 1966171168  }
   0x7   :  { %v72_v5 = vshrl.u32 %v71_v1, 7  ;;  %v97_v21 = vunpack.c.l.s4 %v146_v20  ;;  %vm113_vm1 = vcmp.lt.s32.totalorder %v71_v1, 256 }
   0x8   :  { %v70_v4 = vunpack.c.0.s8 %v69_v3 }
   0x9   :  { %v64_v7 = vld [vmem:[#allocation2] sm:$0xf]  ;;  %v98_v26 = vunpack.c.0.s8 %v97_v21 }
   0xa   :  { %v65_v8 = vsub.f32 %v63_v6, %v64_v7  ;;  %v73_v9 = vsub.s32 %v70_v4, %v72_v5 }
   0xb   :  { %v101_v30 = vsub.s32 %v98_v26, %v72_v5 }
   0xc   :  { %v66_v10 = vmul.f32 %v65_v8, %v65_v8 }
   0xe   :  { %v74_v11 = vrot.slane %v66_v10, %v73_v9 }
  0x10   :  { %v75_v12 = vcombine.high %v74_v11, %v74_v11  ;;  %v79_v13 = vsel %vm78_vm0, %v74_v11, 0.0 }
  0x11   :  { %v80_v14 = vrot.slane %v79_v13, 4 }
  0x12   :  { %v86_v15 = vsel %vm78_vm0, %v75_v12, 0.0 }
  0x13   :  { %v81_v16 = vadd.f32 %v80_v14, %v79_v13  ;;  %v87_v17 = vrot.slane %v86_v15, 4 }
  0x15   :  { %v82_v18 = vrot.slane %v81_v16, 2  ;;  %v88_v19 = vadd.f32 %v87_v17, %v86_v15 }
  0x17   :  { %v83_v22 = vadd.f32 %v82_v18, %v81_v16  ;;  %v89_v23 = vrot.slane %v88_v19, 2 }
  0x19   :  { %v84_v24 = vrot.slane %v83_v22, 1  ;;  %v90_v25 = vadd.f32 %v89_v23, %v88_v19 }
  0x1b   :  { %v85_v27 = vadd.f32 %v84_v24, %v83_v22  ;;  %v91_v28 = vrot.slane %v90_v25, 1 }
  0x1d   :  { %v92_v29 = vadd.f32 %v91_v28, %v90_v25 }
  0x1f   :  { %v95_v31 = vcombine.low %v85_v27, %v92_v29 }
  0x21   :  { %v102_v32 = vrot.slane %v95_v31, %v101_v30 }
  0x23   :  { %v109_v33 = vrot.slane %v102_v32, %v101_v30 }
  0x25   :  { %115 = vst.msk [vmem:[%s173_s2] sm:$0x3] %vm113_vm1, %v109_v33 }
  0x26   :  { %120 = vsyncmov [#allocation3] }
  0x29   :  { %s121_s13 = vpop.sfrf %120 }
  0x2a   :  { %p140_p0 = scmp.ne.s32.totalorder %s121_s13, 0 }
  0x2c   :  { %125 = shalt.err (%p140_p0)  }

</bundles_post_ra>
